<compile_context>
chip_gen: v7x
topology: tpu7x:2x2x1
jax: 0.10.0
libtpu: 0.0.40
codegen_flags: <defaults>
</compile_context>

<pallas_src>
import functools

import jax
import jax.numpy as jnp
from jax.experimental import pallas as pl
from jax.experimental.pallas import tpu as pltpu


# -----------------------------------------------------------------------------
# Fused Pallas kernel: all LightGCN propagation layers + layer mean,
# computed in the transposed layout.
#   E_{k+1}^T = E_k^T @ A_norm^T       (MXU matmul, bf16 operands, f32 acc)
#   out^T     = mean(E_0^T .. E_L^T)
# Everything stays in VMEM / vregs for the whole kernel; no HBM traffic between
# layers and no grid bookkeeping.
# -----------------------------------------------------------------------------
def _lgcn_fused_kernel(adj_t_ref, ego_t_ref, out_ref, *, n_layers):
    """adj_t_ref: (N, N) bf16 = A_norm^T; ego_t_ref: (D, N) f32 = E0^T;
    out_ref: (D, N) f32 = (mean_k A_norm^k E0)^T."""
    emb = ego_t_ref[...]          # (D, N) f32 running embedding (layer 0)
    acc = emb                     # f32 accumulator; layer-0 term kept exact

    # n_layers is small & static -> unrolled Python loop gives the scheduler
    # full visibility; each iteration is one full-width MXU matmul with the
    # lane axis (N = 128) on both operands and on the output.
    for _ in range(n_layers):
        # Re-read adj^T from its VMEM ref every layer (don't pin its vregs
        # across the whole unrolled loop); cast the running emb to bf16 for
        # the MXU, accumulate in f32.
        emb = jnp.dot(
            emb.astype(jnp.bfloat16),
            adj_t_ref[...],
            preferred_element_type=jnp.float32,
        )
        acc = acc + emb

    inv = jnp.float32(1.0 / (n_layers + 1))          # fused layer-mean
    out_ref[...] = (acc * inv).astype(out_ref.dtype)  # lane-dense (D, 128) store


# -----------------------------------------------------------------------------
# Forward wrapper: mirrors LGCN_Encoder.forward().
# Concat / transpose / cast / split are thin jitted XLA glue around the single
# fused kernel (folding the non-128-aligned concat into the kernel would force
# in-kernel relayouts for negligible gain at this size).
# -----------------------------------------------------------------------------
@functools.partial(jax.jit, static_argnames=("n_layers",))
def lgcn_encoder_forward(norm_adj, user_emb, item_emb, *, n_layers):
    """Returns (user_all_embeddings, item_all_embeddings)."""
    user_num, d = user_emb.shape
    n = norm_adj.shape[0]

    # Transposed layout so the lane axis carries N (=128), not D (=32).
    ego_t = jnp.concatenate([user_emb, item_emb], axis=0).T     # (D, N) f32
    adj_t = norm_adj.T.astype(jnp.bfloat16)                     # (N, N) bf16 (MXU)

    out_t = pl.pallas_call(
        functools.partial(_lgcn_fused_kernel, n_layers=n_layers),
        out_shape=jax.ShapeDtypeStruct((d, n), jnp.float32),
        # Grid-less call: whole arrays are single VMEM-resident blocks
        # (block == full array, so no (8,128) tiling constraint issues).
        in_specs=[
            pl.BlockSpec(memory_space=pltpu.MemorySpace.VMEM),   # adj^T (N, N) bf16
            pl.BlockSpec(memory_space=pltpu.MemorySpace.VMEM),   # ego^T (D, N) f32
        ],
        out_specs=pl.BlockSpec(memory_space=pltpu.MemorySpace.VMEM),
    )(adj_t, ego_t)

    mean_emb = out_t.T                                           # (N, D)
    return mean_emb[:user_num], mean_emb[user_num:]


# -----------------------------------------------------------------------------
# Parameter / graph construction (deterministic, synthetic).
# -----------------------------------------------------------------------------
def xavier_uniform(key, fan_in, fan_out, dtype=jnp.float32):
    bound = jnp.sqrt(6.0 / (fan_in + fan_out))
    return jax.random.uniform(
        key, (fan_in, fan_out), dtype=dtype, minval=-bound, maxval=bound
    )


def build_norm_adj(key, user_num, item_num, dtype=jnp.float32):
    """Dense symmetric-normalized bipartite adjacency D^-1/2 A D^-1/2."""
    # TODO(synk): at realistic LightGCN scale norm_adj must stay sparse (CSR +
    # gather/scatter DMA); dense (N, N) is only viable for this toy N.
    n = user_num + item_num
    r = (jax.random.uniform(key, (user_num, item_num)) < 0.1).astype(dtype)
    adj = jnp.zeros((n, n), dtype=dtype)
    adj = adj.at[:user_num, user_num:].set(r)
    adj = adj.at[user_num:, :user_num].set(r.T)
    deg = jnp.sum(adj, axis=1)
    d_inv_sqrt = jnp.where(deg > 0, 1.0 / jnp.sqrt(jnp.maximum(deg, 1e-12)), 0.0)
    return adj * d_inv_sqrt[:, None] * d_inv_sqrt[None, :]


if __name__ == "__main__":
    user_num, item_num, emb_size, n_layers = 48, 80, 32, 3

    key = jax.random.PRNGKey(0)
    k_user, k_item, k_graph = jax.random.split(key, 3)

    user_emb = xavier_uniform(k_user, user_num, emb_size)
    item_emb = xavier_uniform(k_item, item_num, emb_size)
    norm_adj = build_norm_adj(k_graph, user_num, item_num)

    user_out, item_out = lgcn_encoder_forward(
        norm_adj, user_emb, item_emb, n_layers=n_layers
    )
    jax.block_until_ready((user_out, item_out))

    # Pure-JAX f32 reference. The kernel feeds the MXU bf16 operands (f32
    # accumulation), so use a bf16-appropriate tolerance.
    ego = jnp.concatenate([user_emb, item_emb], axis=0)
    all_e = [ego]
    e = ego
    for _ in range(n_layers):
        e = norm_adj @ e
        all_e.append(e)
    ref = jnp.mean(jnp.stack(all_e, axis=1), axis=1)
    assert user_out.shape == (user_num, emb_size)
    assert item_out.shape == (item_num, emb_size)
    assert jnp.allclose(user_out, ref[:user_num], atol=2e-2, rtol=2e-2)
    assert jnp.allclose(item_out, ref[user_num:], atol=2e-2, rtol=2e-2)

    print("KERNEL_OK")
</pallas_src>

<mosaic_0001>
module attributes {stable_mosaic.version = 11 : i64} {
  func.func @_lgcn_fused_kernel(%arg0: memref<128x128xbf16, #tpu.memory_space<vmem>>, %arg1: memref<32x128xf32, #tpu.memory_space<vmem>>, %arg2: memref<32x128xf32, #tpu.memory_space<vmem>>) attributes {dimension_semantics = [], scalar_prefetch = 0 : i64, scratch_operands = 0 : i64, tpu.core_type = #tpu.core_type<tc>} {
    %c0 = arith.constant 0 : index
    %c0_0 = arith.constant 0 : index
    %0 = vector.load %arg1[%c0, %c0_0] : memref<32x128xf32, #tpu.memory_space<vmem>>, vector<32x128xf32>
    %1 = arith.truncf %0 : vector<32x128xf32> to vector<32x128xbf16>
    %c0_1 = arith.constant 0 : index
    %c0_2 = arith.constant 0 : index
    %2 = vector.load %arg0[%c0_1, %c0_2] : memref<128x128xbf16, #tpu.memory_space<vmem>>, vector<128x128xbf16>
    %cst = arith.constant dense<0.000000e+00> : vector<32x128xf32>
    %3 = tpu.matmul %1, %2, %cst {dimension_numbers = #tpu.dot_dimension_numbers<[1], [0], [0], [1], [0, 0, 1, 1], [], []>} : vector<32x128xbf16>, vector<128x128xbf16>, vector<32x128xf32> -> vector<32x128xf32>
    %4 = arith.addf %0, %3 : vector<32x128xf32>
    %5 = arith.truncf %3 : vector<32x128xf32> to vector<32x128xbf16>
    %c0_3 = arith.constant 0 : index
    %c0_4 = arith.constant 0 : index
    %6 = vector.load %arg0[%c0_3, %c0_4] : memref<128x128xbf16, #tpu.memory_space<vmem>>, vector<128x128xbf16>
    %cst_5 = arith.constant dense<0.000000e+00> : vector<32x128xf32>
    %7 = tpu.matmul %5, %6, %cst_5 {dimension_numbers = #tpu.dot_dimension_numbers<[1], [0], [0], [1], [0, 0, 1, 1], [], []>} : vector<32x128xbf16>, vector<128x128xbf16>, vector<32x128xf32> -> vector<32x128xf32>
    %8 = arith.addf %4, %7 : vector<32x128xf32>
    %9 = arith.truncf %7 : vector<32x128xf32> to vector<32x128xbf16>
    %c0_6 = arith.constant 0 : index
    %c0_7 = arith.constant 0 : index
    %10 = vector.load %arg0[%c0_6, %c0_7] : memref<128x128xbf16, #tpu.memory_space<vmem>>, vector<128x128xbf16>
    %cst_8 = arith.constant dense<0.000000e+00> : vector<32x128xf32>
    %11 = tpu.matmul %9, %10, %cst_8 {dimension_numbers = #tpu.dot_dimension_numbers<[1], [0], [0], [1], [0, 0, 1, 1], [], []>} : vector<32x128xbf16>, vector<128x128xbf16>, vector<32x128xf32> -> vector<32x128xf32>
    %12 = arith.addf %8, %11 : vector<32x128xf32>
    %cst_9 = arith.constant 2.500000e-01 : f32
    %13 = vector.broadcast %cst_9 : f32 to vector<32x128xf32>
    %14 = arith.mulf %12, %13 : vector<32x128xf32>
    %c0_10 = arith.constant 0 : index
    %c0_11 = arith.constant 0 : index
    %15 = vector.load %arg2[%c0_10, %c0_11] : memref<32x128xf32, #tpu.memory_space<vmem>>, vector<32x128xf32>
    tpu.vector_store %arg2[%c0_10, %c0_11], %14 {strides = array<i32>} : memref<32x128xf32, #tpu.memory_space<vmem>>, vector<32x128xf32>,
    return
  }
}

</mosaic_0001>

<bundles_post_ra>
// kernel: lgcn_encoder_forward.1
= control target key start
LH: loop header
LB: loop body
LE: loop exit
PB: predicated region body
PF: predicated region fallthrough
CT: control target
= control target key end

     0   :  { %s430_s0 = inlined_call_operand.vmem [shape: bf16[128,128], index: 0, kind: input, shape index: {}]   ;;  %s431_s1 = inlined_call_operand.vmem [shape: f32[32,128], index: 1, kind: input, shape index: {}]   ;;  %s432_s2 = inlined_call_operand.vmem [shape: f32[32,128], index: 2, kind: output, shape index: {}]  }
   0x1   :  { %v355_v0 = vld [vmem:[%s430_s0] sm:$0xff]   ;;  %v356_v1 = vld [vmem:[%s430_s0 + $0x8] sm:$0xff]   ;;  %v357_v2 = vld [vmem:[%s430_s0 + $0x10] sm:$0xff]  }
   0x2   :  { %295 = vmatprep.subr.bf16.mxu0 %v355_v0  ;;  %315 = vmatprep.subr.bf16.mxu1 %v355_v0  ;;  %v358_v3 = vld [vmem:[%s430_s0 + $0x18] sm:$0xff]   ;;  %v12_v4 = vld [vmem:[%s431_s1] sm:$0xff]  ;;  %v396_v5 = vld [vmem:[%s431_s1 + $0x8] sm:$0xff] }
   0x3   :  { %296 = vmatpush3.bf16.msra.mxu0 %v355_v0  ;;  %316 = vmatpush3.bf16.msra.mxu1 %v355_v0  ;;  %v16_v6 = vpack.c.bf16 %v396_v5, %v12_v4  ;;  %v359_v7 = vld [vmem:[%s430_s0 + $0x20] sm:$0xff]   ;;  %v360_v8 = vld [vmem:[%s430_s0 + $0x28] sm:$0xff]   ;;  %v361_v9 = vld [vmem:[%s430_s0 + $0x30] sm:$0xff]  }
   0x4   :  { %297 = vmatprep.subr.bf16.mxu0 %v356_v1  ;;  %317 = vmatprep.subr.bf16.mxu1 %v356_v1  ;;  %v362_v10 = vld [vmem:[%s430_s0 + $0x38] sm:$0xff]   ;;  %v14_v11 = vld [vmem:[%s431_s1 + $0x10] sm:$0xff] }
   0x5   :  { %311 = vmatprep.mubr.bf16.mxu0 %v16_v6  ;;  %v15_v12 = vld [vmem:[%s431_s1 + $0x18] sm:$0xff] }
   0x6   :  { %v17_v13 = vpack.c.bf16 %v15_v12, %v14_v11 }
   0x7   :  { %298 = vmatpush3.bf16.msra.mxu0 %v356_v1  ;;  %318 = vmatpush3.bf16.msra.mxu1 %v356_v1 }
   0x8   :  { %299 = vmatprep.subr.bf16.mxu0 %v357_v2  ;;  %319 = vmatprep.subr.bf16.mxu1 %v357_v2 }
   0xb   :  { %300 = vmatpush3.bf16.msra.mxu0 %v357_v2  ;;  %320 = vmatpush3.bf16.msra.mxu1 %v357_v2 }
   0xc   :  { %301 = vmatprep.subr.bf16.mxu0 %v358_v3  ;;  %321 = vmatprep.subr.bf16.mxu1 %v358_v3 }
   0xf   :  { %302 = vmatpush3.bf16.msra.mxu0 %v358_v3  ;;  %322 = vmatpush3.bf16.msra.mxu1 %v358_v3 }
  0x10   :  { %303 = vmatprep.subr.bf16.mxu0 %v359_v7  ;;  %323 = vmatprep.subr.bf16.mxu1 %v359_v7 }
  0x13   :  { %304 = vmatpush3.bf16.msra.mxu0 %v359_v7  ;;  %324 = vmatpush3.bf16.msra.mxu1 %v359_v7 }
  0x14   :  { %305 = vmatprep.subr.bf16.mxu0 %v360_v8  ;;  %325 = vmatprep.subr.bf16.mxu1 %v360_v8 }
  0x17   :  { %306 = vmatpush3.bf16.msra.mxu0 %v360_v8  ;;  %326 = vmatpush3.bf16.msra.mxu1 %v360_v8 }
  0x18   :  { %307 = vmatprep.subr.bf16.mxu0 %v361_v9  ;;  %327 = vmatprep.subr.bf16.mxu1 %v361_v9 }
  0x1b   :  { %308 = vmatpush3.bf16.msra.mxu0 %v361_v9  ;;  %328 = vmatpush3.bf16.msra.mxu1 %v361_v9 }
  0x1c   :  { %309 = vmatprep.subr.bf16.mxu0 %v362_v10  ;;  %329 = vmatprep.subr.bf16.mxu1 %v362_v10 }
  0x1f   :  { %310 = vmatpush3.bf16.msra.mxu0 %v362_v10  ;;  %330 = vmatpush3.bf16.msra.mxu1 %v362_v10 }
  0x20   :  { %335 = vmatprep.subr.bf16.mxu0 %v355_v0 }
  0x22   :  { %312 = vmatmul.mubr.bf16.vlgmr.msra.gmra.mrb[0].mxu0 %v17_v13 }
  0x23   :  { %336 = vmatpush3.bf16.msra.mxu0 %v355_v0 }
  0x24   :  { %337 = vmatprep.subr.bf16.mxu0 %v356_v1 }
  0x27   :  { %338 = vmatpush3.bf16.msra.mxu0 %v356_v1 }
  0x28   :  { %339 = vmatprep.subr.bf16.mxu0 %v357_v2 }
  0x2b   :  { %340 = vmatpush3.bf16.msra.mxu0 %v357_v2 }
  0x2c   :  { %341 = vmatprep.subr.bf16.mxu0 %v358_v3 }
  0x2f   :  { %342 = vmatpush3.bf16.msra.mxu0 %v358_v3 }
  0x30   :  { %343 = vmatprep.subr.bf16.mxu0 %v359_v7 }
  0x33   :  { %344 = vmatpush3.bf16.msra.mxu0 %v359_v7 }
  0x34   :  { %345 = vmatprep.subr.bf16.mxu0 %v360_v8 }
  0x37   :  { %346 = vmatpush3.bf16.msra.mxu0 %v360_v8 }
  0x38   :  { %347 = vmatprep.subr.bf16.mxu0 %v361_v9 }
  0x3b   :  { %348 = vmatpush3.bf16.msra.mxu0 %v361_v9 }
  0x3c   :  { %349 = vmatprep.subr.bf16.mxu0 %v362_v10 }
  0x3f   :  { %350 = vmatpush3.bf16.msra.mxu0 %v362_v10 }
  0xf5   :  { %v313_v14 = vpop.f32.mrb[0].mxu0 }
  0xf6   :  { %v116_v15 = vpop.f32.mrb[1].mxu0  ;;  %v133_v20 = vadd.f32 %v313_v14, %v14_v11 }
  0xf7   :  { %v314_v16 = vpop.f32.mrb[2].mxu0  ;;  %v131_v21 = vadd.f32 %v116_v15, %v12_v4 }
  0xf8   :  { %v136_v17 = vpack.c.bf16 %v314_v16, %v313_v14  ;;  %v119_v18 = vpop.f32.mrb[3].mxu0  ;;  %v134_v23 = vadd.f32 %v314_v16, %v15_v12 }
  0xf9   :  { %v135_v19 = vpack.c.bf16 %v119_v18, %v116_v15  ;;  %v132_v26 = vadd.f32 %v119_v18, %v396_v5 }
  0xfb   :  { %331 = vmatprep.mubr.bf16.mxu1 %v135_v19 }
  0xfc   :  { %332 = vmatmul.mubr.bf16.vlgmr.msra.gmra.mrb[0].mxu1 %v136_v17 }
 0x1cf   :  { %v333_v22 = vpop.f32.mrb[0].mxu1 }
 0x1d0   :  { %v188_v24 = vadd.f32 %v333_v22, %v133_v20  ;;  %v171_v25 = vpop.f32.mrb[1].mxu1 }
 0x1d1   :  { %v186_v27 = vadd.f32 %v171_v25, %v131_v21  ;;  %v334_v28 = vpop.f32.mrb[2].mxu1 }
 0x1d2   :  { %v189_v29 = vadd.f32 %v334_v28, %v134_v23  ;;  %v191_v30 = vpack.c.bf16 %v334_v28, %v333_v22  ;;  %v174_v31 = vpop.f32.mrb[3].mxu1 }
 0x1d3   :  { %v187_v32 = vadd.f32 %v174_v31, %v132_v26  ;;  %v190_v33 = vpack.c.bf16 %v174_v31, %v171_v25 }
 0x1d5   :  { %351 = vmatprep.mubr.bf16.mxu0 %v190_v33 }
 0x1d6   :  { %352 = vmatmul.mubr.bf16.vlgmr.msra.gmra.mrb[4].mxu0 %v191_v30 }
 0x2a9   :  { %v353_v34 = vpop.f32.mrb[4].mxu0 }
 0x2aa   :  { %v243_v35 = vadd.f32 %v353_v34, %v188_v24  ;;  %v226_v36 = vpop.f32.mrb[5].mxu0 }
 0x2ab   :  { %v241_v37 = vadd.f32 %v226_v36, %v186_v27  ;;  %v354_v38 = vpop.f32.mrb[6].mxu0 }
 0x2ac   :  { %v247_v39 = vmul.f32 0.25, %v243_v35  ;;  %v244_v40 = vadd.f32 %v354_v38, %v189_v29  ;;  %v229_v41 = vpop.f32.mrb[7].mxu0 }
 0x2ad   :  { %v245_v42 = vmul.f32 0.25, %v241_v37  ;;  %v242_v43 = vadd.f32 %v229_v41, %v187_v32 }
 0x2ae   :  { %251 = vst [vmem:[%s432_s2 + $0x10] sm:$0xff] %v247_v39  ;;  %v248_v44 = vmul.f32 0.25, %v244_v40 }
 0x2af   :  { %249 = vst [vmem:[%s432_s2] sm:$0xff] %v245_v42  ;;  %v246_v45 = vmul.f32 0.25, %v242_v43 }
 0x2b0   :  { %252 = vst [vmem:[%s432_s2 + $0x18] sm:$0xff] %v248_v44 }
 0x2b1   :  { %250 = vst [vmem:[%s432_s2 + $0x8] sm:$0xff] %v246_v45 }

</bundles_post_ra>
